<compile_context>
chip_gen: v5e
topology: v5e:2x2
jax: 0.10.0
libtpu: 0.0.40
codegen_flags: <defaults>
</compile_context>

<pallas_src>
import jax
import jax.numpy as jnp
from jax.experimental import pallas as pl
from jax.experimental.pallas import tpu as pltpu


def _mlp_embedding_kernel(x_ref, w1_ref, b1_ref, w2_ref, b2_ref, out_ref):
    # x_ref : (TN, C*HW)  one batch tile, storage dtype, fed straight to the MXU
    # w1_ref: (C*HW, C)   pooling-fused first-layer weight (f32)
    # b1_ref: (1, C)
    # w2_ref: (C, Dp)     b2_ref: (1, Dp)
    # out_ref: (TN, Dp)
    h = jnp.dot(x_ref[...], w1_ref[...], preferred_element_type=jnp.float32)
    h = jnp.maximum(h + b1_ref[...], 0.0)
    y = jnp.dot(h, w2_ref[...], preferred_element_type=jnp.float32) + b2_ref[...]
    out_ref[...] = y.astype(out_ref.dtype)


def mlp_embedding_forward(x_nchw, w1, b1, w2, b2,
                          *,
                          x_window_budget_bytes=24 * 1024 * 1024,  # both x buffers
                          vmem_limit_bytes=48 * 1024 * 1024,       # v7x-safe (64 MiB part)
                          lane_dense_out=False):
    """x_nchw: (N, C, H, W); w1: (C, C); b1: (C,); w2: (C, D); b2: (D,)."""
    N, C, H, W = x_nchw.shape
    HW = H * W
    D = w2.shape[1]

    # ---- fuse AdaptiveAvgPool2d((1,1)) + flatten into the first matmul -------
    # pooled @ w1 == x2d @ W1_eff   with   W1_eff[c*HW + s, :] = w1[c, :] / HW.
    # Keep W1_eff in f32 so the 1/HW scaling is exact.  (For bf16 x one could
    # cast W1_eff to bf16 to keep the MXU operands narrow, at a tiny precision
    # cost.)
    w1_eff = jnp.repeat(w1.astype(jnp.float32), HW, axis=0) / float(HW)  # (C*HW, C)
    b1_f32 = b1.astype(jnp.float32).reshape(1, C)
    w2_f32 = w2.astype(jnp.float32)
    b2_f32 = b2.astype(jnp.float32).reshape(1, D)

    # Optional lane-dense output (unmasked vst): round D up to 128 lanes.
    if lane_dense_out:
        d_pad = pl.cdiv(D, 128) * 128
        w2_f32 = jnp.pad(w2_f32, ((0, 0), (0, d_pad - D)))
        b2_f32 = jnp.pad(b2_f32, ((0, 0), (0, d_pad - D)))
    else:
        d_pad = D

    # ---- batch tiling ---------------------------------------------------------
    itemsize = jnp.dtype(x_nchw.dtype).itemsize
    row_bytes = C * HW * itemsize
    n_pad8 = pl.cdiv(N, 8) * 8

    # TN limited only by the double-buffered x window budget (multiple of 8).
    tn = max(8, (x_window_budget_bytes // (2 * row_bytes)) // 8 * 8)
    # Guarantee >= 2 grid steps when the batch allows it, so both v7x
    # TensorCores receive tiles under dimension_semantics=("parallel",).
    if n_pad8 >= 16:
        tn = min(tn, max(8, (n_pad8 // 2) // 8 * 8))
    tn = min(tn, n_pad8)
    n_pad = pl.cdiv(N, tn) * tn          # pad batch so TN divides it exactly

    # Free view: (N, C*H*W) — channels*spatial flattened onto the lane axis.
    x2d = x_nchw.reshape(N, C * HW)
    if n_pad != N:
        x2d = jnp.pad(x2d, ((0, n_pad - N), (0, 0)))   # zero rows; sliced off below

    # Advisory cost estimate (HBM-read-bound kernel).
    flops = 2 * n_pad * (C * HW) * C + 2 * n_pad * C * d_pad
    bytes_accessed = (n_pad * C * HW * itemsize          # x read
                      + (C * HW * C + C + C * d_pad + d_pad) * 4  # resident params
                      + n_pad * d_pad * itemsize)        # output write

    out = pl.pallas_call(
        _mlp_embedding_kernel,
        out_shape=jax.ShapeDtypeStruct((n_pad, d_pad), x_nchw.dtype),
        grid_spec=pltpu.PrefetchScalarGridSpec(
            num_scalar_prefetch=0,
            grid=(n_pad // tn,),
            in_specs=[
                # x: tiled over batch -> double-buffered DMA overlapped with compute
                pl.BlockSpec((tn, C * HW), lambda i: (i, 0)),
                # weights / biases: constant index maps -> resident in VMEM
                pl.BlockSpec((C * HW, C), lambda i: (0, 0)),
                pl.BlockSpec((1, C), lambda i: (0, 0)),
                pl.BlockSpec((C, d_pad), lambda i: (0, 0)),
                pl.BlockSpec((1, d_pad), lambda i: (0, 0)),
            ],
            out_specs=pl.BlockSpec((tn, d_pad), lambda i: (i, 0)),
        ),
        compiler_params=pltpu.CompilerParams(
            # batch tiles are independent -> shard across TensorCores (v7x megacore)
            dimension_semantics=("parallel",),
            vmem_limit_bytes=vmem_limit_bytes,
        ),
        cost_estimate=pl.CostEstimate(
            flops=flops, transcendentals=0, bytes_accessed=bytes_accessed),
    )(x2d, w1_eff, b1_f32, w2_f32, b2_f32)

    if n_pad != N:
        out = out[:N]
    if d_pad != D:
        out = out[:, :D]
    return out


def _reference(x_nchw, w1, b1, w2, b2):
    pooled = jnp.mean(x_nchw, axis=(2, 3))               # (N, C)
    h = jnp.maximum(pooled @ w1 + b1, 0.0)
    return h @ w2 + b2


if __name__ == "__main__":
    # Small shapes consistent with the module: batch=2, in_channels=4,
    # spatial=16x16, desc_channels=8.
    N, C, H, W, D = 2, 4, 16, 16, 8

    key = jax.random.PRNGKey(0)
    kx, k1, kb1, k2, kb2 = jax.random.split(key, 5)

    x = jax.random.normal(kx, (N, C, H, W), dtype=jnp.float32)
    # Deterministic synthetic parameters (shapes from nn.Linear(C,C), nn.Linear(C,D)),
    # stored as (in_features, out_features).
    w1 = jax.random.normal(k1, (C, C), dtype=jnp.float32) * 0.1
    b1 = jax.random.normal(kb1, (C,), dtype=jnp.float32) * 0.1
    w2 = jax.random.normal(k2, (C, D), dtype=jnp.float32) * 0.1
    b2 = jax.random.normal(kb2, (D,), dtype=jnp.float32) * 0.1

    ref = _reference(x, w1, b1, w2, b2)

    out = mlp_embedding_forward(x, w1, b1, w2, b2)
    out = jax.block_until_ready(out)
    assert out.shape == (N, D)
    assert jnp.allclose(out, ref, atol=1e-5, rtol=1e-5)

    # Also exercise the optional lane-dense-output path.
    out_ld = mlp_embedding_forward(x, w1, b1, w2, b2, lane_dense_out=True)
    out_ld = jax.block_until_ready(out_ld)
    assert out_ld.shape == (N, D)
    assert jnp.allclose(out_ld, ref, atol=1e-5, rtol=1e-5)

    print("KERNEL_OK")
</pallas_src>

<mosaic_0001>
module attributes {stable_mosaic.version = 11 : i64} {
  func.func @_mlp_embedding_kernel(%arg0: i32, %arg1: memref<8x1024xf32, #tpu.memory_space<vmem>>, %arg2: memref<1024x4xf32, #tpu.memory_space<vmem>>, %arg3: memref<1x4xf32, #tpu.memory_space<vmem>>, %arg4: memref<4x8xf32, #tpu.memory_space<vmem>>, %arg5: memref<1x8xf32, #tpu.memory_space<vmem>>, %arg6: memref<8x8xf32, #tpu.memory_space<vmem>>) attributes {dimension_semantics = [#tpu.dimension_semantics<parallel>], iteration_bounds = array<i64: 1>, scalar_prefetch = 0 : i64, scratch_operands = 0 : i64, tpu.core_type = #tpu.core_type<tc>, window_params = [{transform_indices = @transform_0, window_bounds = array<i64: 8, 1024>}, {pipeline_mode = #tpu.pipeline_mode<synchronous>, transform_indices = @transform_1, window_bounds = array<i64: 1024, 4>}, {pipeline_mode = #tpu.pipeline_mode<synchronous>, transform_indices = @transform_2, window_bounds = array<i64: 1, 4>}, {pipeline_mode = #tpu.pipeline_mode<synchronous>, transform_indices = @transform_3, window_bounds = array<i64: 4, 8>}, {pipeline_mode = #tpu.pipeline_mode<synchronous>, transform_indices = @transform_4, window_bounds = array<i64: 1, 8>}, {transform_indices = @transform_5, window_bounds = array<i64: 8, 8>}]} {
    %c0 = arith.constant 0 : index
    %c0_0 = arith.constant 0 : index
    %0 = vector.load %arg1[%c0, %c0_0] : memref<8x1024xf32, #tpu.memory_space<vmem>>, vector<8x1024xf32>
    %c0_1 = arith.constant 0 : index
    %c0_2 = arith.constant 0 : index
    %1 = vector.load %arg2[%c0_1, %c0_2] : memref<1024x4xf32, #tpu.memory_space<vmem>>, vector<1024x4xf32>
    %cst = arith.constant dense<0.000000e+00> : vector<8x4xf32>
    %2 = tpu.matmul %0, %1, %cst {dimension_numbers = #tpu.dot_dimension_numbers<[1], [0], [0], [1], [0, 0, 1, 1], [], []>} : vector<8x1024xf32>, vector<1024x4xf32>, vector<8x4xf32> -> vector<8x4xf32>
    %c0_3 = arith.constant 0 : index
    %c0_4 = arith.constant 0 : index
    %3 = vector.load %arg3[%c0_3, %c0_4] : memref<1x4xf32, #tpu.memory_space<vmem>>, vector<1x4xf32>
    %4 = vector.broadcast %3 : vector<1x4xf32> to vector<8x4xf32>
    %5 = arith.addf %2, %4 : vector<8x4xf32>
    %cst_5 = arith.constant 0.000000e+00 : f32
    %6 = vector.broadcast %cst_5 : f32 to vector<8x4xf32>
    %7 = arith.maximumf %5, %6 : vector<8x4xf32>
    %c0_6 = arith.constant 0 : index
    %c0_7 = arith.constant 0 : index
    %8 = vector.load %arg4[%c0_6, %c0_7] : memref<4x8xf32, #tpu.memory_space<vmem>>, vector<4x8xf32>
    %cst_8 = arith.constant dense<0.000000e+00> : vector<8x8xf32>
    %9 = tpu.matmul %7, %8, %cst_8 {dimension_numbers = #tpu.dot_dimension_numbers<[1], [0], [0], [1], [0, 0, 1, 1], [], []>} : vector<8x4xf32>, vector<4x8xf32>, vector<8x8xf32> -> vector<8x8xf32>
    %c0_9 = arith.constant 0 : index
    %c0_10 = arith.constant 0 : index
    %10 = vector.load %arg5[%c0_9, %c0_10] : memref<1x8xf32, #tpu.memory_space<vmem>>, vector<1x8xf32>
    %11 = vector.broadcast %10 : vector<1x8xf32> to vector<8x8xf32>
    %12 = arith.addf %9, %11 : vector<8x8xf32>
    %c0_11 = arith.constant 0 : index
    %c0_12 = arith.constant 0 : index
    %13 = vector.load %arg6[%c0_11, %c0_12] : memref<8x8xf32, #tpu.memory_space<vmem>>, vector<8x8xf32>
    tpu.vector_store %arg6[%c0_11, %c0_12], %12 {strides = array<i32>} : memref<8x8xf32, #tpu.memory_space<vmem>>, vector<8x8xf32>,
    return
  }
  func.func @transform_0(%arg0: i32) -> (i32, i32) {
    %c0_i32 = arith.constant 0 : i32
    %c0_i32_0 = arith.constant 0 : i32
    return %arg0, %c0_i32 : i32, i32
  }
  func.func @transform_1(%arg0: i32) -> (i32, i32) {
    %c0_i32 = arith.constant 0 : i32
    %c0_i32_0 = arith.constant 0 : i32
    %c0_i32_1 = arith.constant 0 : i32
    return %c0_i32, %c0_i32_0 : i32, i32
  }
  func.func @transform_2(%arg0: i32) -> (i32, i32) {
    %c0_i32 = arith.constant 0 : i32
    %c0_i32_0 = arith.constant 0 : i32
    %c0_i32_1 = arith.constant 0 : i32
    return %c0_i32, %c0_i32_0 : i32, i32
  }
  func.func @transform_3(%arg0: i32) -> (i32, i32) {
    %c0_i32 = arith.constant 0 : i32
    %c0_i32_0 = arith.constant 0 : i32
    %c0_i32_1 = arith.constant 0 : i32
    return %c0_i32, %c0_i32_0 : i32, i32
  }
  func.func @transform_4(%arg0: i32) -> (i32, i32) {
    %c0_i32 = arith.constant 0 : i32
    %c0_i32_0 = arith.constant 0 : i32
    %c0_i32_1 = arith.constant 0 : i32
    return %c0_i32, %c0_i32_0 : i32, i32
  }
  func.func @transform_5(%arg0: i32) -> (i32, i32) {
    %c0_i32 = arith.constant 0 : i32
    %c0_i32_0 = arith.constant 0 : i32
    return %arg0, %c0_i32 : i32, i32
  }
}

</mosaic_0001>

<bundles_post_ra>
// kernel: tpu_custom_call.1
= control target key start
LH: loop header
LB: loop body
LE: loop exit
PB: predicated region body
PF: predicated region fallthrough
CT: control target
= control target key end

     0   :  { %s855_s0 = inlined_call_operand.vmem [shape: f32[8,1024], index: 0, kind: input, shape index: {}]   ;;  %s856_s1 = inlined_call_operand.vmem [shape: f32[1024,4], index: 1, kind: input, shape index: {}]   ;;  %s857_s2 = inlined_call_operand.vmem [shape: f32[1,4], index: 2, kind: input, shape index: {}]   ;;  %s858_s3 = inlined_call_operand.vmem [shape: f32[4,8], index: 3, kind: input, shape index: {}]   ;;  %s859_s4 = inlined_call_operand.vmem [shape: f32[1,8], index: 4, kind: input, shape index: {}]   ;;  %s860_s5 = inlined_call_operand.hbm [shape: f32[8,8], index: 5, kind: output, shape index: {}]  }
   0x1   :  { %v76_v0 = vld [vmem:[%s856_s1 + $0x178] sm:$0xff]  ;;  %v75_v2 = vld [vmem:[%s856_s1 + $0x170] sm:$0xff]  ;;  %v74_v6 = vld [vmem:[%s856_s1 + $0x168] sm:$0xff] }
   0x2   :  { %v44_v1 = vld [vmem:[%s856_s1 + $0x78] sm:$0xff]  ;;  %201 = vmatpush.msra.mxu2 %v76_v0  ;;  %v43_v4 = vld [vmem:[%s856_s1 + $0x70] sm:$0xff]  ;;  %v42_v8 = vld [vmem:[%s856_s1 + $0x68] sm:$0xff] }
   0x3   :  { %161 = vmatpush.msra.mxu0 %v44_v1  ;;  %v92_v3 = vld [vmem:[%s856_s1 + $0x1f8] sm:$0xff]  ;;  %v91_v7 = vld [vmem:[%s856_s1 + $0x1f0] sm:$0xff]  ;;  %v90_v10 = vld [vmem:[%s856_s1 + $0x1e8] sm:$0xff] }
   0x4   :  { %v60_v5 = vld [vmem:[%s856_s1 + $0xf8] sm:$0xff]  ;;  %221 = vmatpush.msra.mxu3 %v92_v3  ;;  %202 = vmatpush.msra.mxu2 %v75_v2  ;;  %v59_v9 = vld [vmem:[%s856_s1 + $0xf0] sm:$0xff]  ;;  %v73_v11 = vld [vmem:[%s856_s1 + $0x160] sm:$0xff] }
   0x5   :  { %181 = vmatpush.msra.mxu1 %v60_v5  ;;  %162 = vmatpush.msra.mxu0 %v43_v4  ;;  %v41_v12 = vld [vmem:[%s856_s1 + $0x60] sm:$0xff]  ;;  %v58_v13 = vld [vmem:[%s856_s1 + $0xe8] sm:$0xff]  ;;  %v72_v16 = vld [vmem:[%s856_s1 + $0x158] sm:$0xff] }
   0x6   :  { %222 = vmatpush.msra.mxu3 %v91_v7  ;;  %203 = vmatpush.msra.mxu2 %v74_v6  ;;  %v89_v14 = vld [vmem:[%s856_s1 + $0x1e0] sm:$0xff]  ;;  %v40_v17 = vld [vmem:[%s856_s1 + $0x58] sm:$0xff]  ;;  %v71_v20 = vld [vmem:[%s856_s1 + $0x150] sm:$0xff] }
   0x7   :  { %182 = vmatpush.msra.mxu1 %v59_v9  ;;  %163 = vmatpush.msra.mxu0 %v42_v8  ;;  %v57_v15 = vld [vmem:[%s856_s1 + $0xe0] sm:$0xff]  ;;  %v88_v18 = vld [vmem:[%s856_s1 + $0x1d8] sm:$0xff]  ;;  %v39_v21 = vld [vmem:[%s856_s1 + $0x50] sm:$0xff] }
   0x8   :  { %223 = vmatpush.msra.mxu3 %v90_v10  ;;  %204 = vmatpush.msra.mxu2 %v73_v11  ;;  %v56_v19 = vld [vmem:[%s856_s1 + $0xd8] sm:$0xff]  ;;  %v87_v22 = vld [vmem:[%s856_s1 + $0x1d0] sm:$0xff]  ;;  %v70_v24 = vld [vmem:[%s856_s1 + $0x148] sm:$0xff] }
   0x9   :  { %183 = vmatpush.msra.mxu1 %v58_v13  ;;  %164 = vmatpush.msra.mxu0 %v41_v12  ;;  %v55_v23 = vld [vmem:[%s856_s1 + $0xd0] sm:$0xff]  ;;  %v38_v25 = vld [vmem:[%s856_s1 + $0x48] sm:$0xff]  ;;  %v69_v28 = vld [vmem:[%s856_s1 + $0x140] sm:$0xff] }
   0xa   :  { %224 = vmatpush.msra.mxu3 %v89_v14  ;;  %205 = vmatpush.msra.mxu2 %v72_v16  ;;  %v86_v26 = vld [vmem:[%s856_s1 + $0x1c8] sm:$0xff]  ;;  %v37_v29 = vld [vmem:[%s856_s1 + $0x40] sm:$0xff]  ;;  %v68_v32 = vld [vmem:[%s856_s1 + $0x138] sm:$0xff] }
   0xb   :  { %184 = vmatpush.msra.mxu1 %v57_v15  ;;  %165 = vmatpush.msra.mxu0 %v40_v17  ;;  %v54_v27 = vld [vmem:[%s856_s1 + $0xc8] sm:$0xff]  ;;  %v85_v30 = vld [vmem:[%s856_s1 + $0x1c0] sm:$0xff]  ;;  %v36_v33 = vld [vmem:[%s856_s1 + $0x38] sm:$0xff] }
   0xc   :  { %225 = vmatpush.msra.mxu3 %v88_v18  ;;  %206 = vmatpush.msra.mxu2 %v71_v20  ;;  %v53_v31 = vld [vmem:[%s856_s1 + $0xc0] sm:$0xff]  ;;  %v84_v34 = vld [vmem:[%s856_s1 + $0x1b8] sm:$0xff]  ;;  %v67_v36 = vld [vmem:[%s856_s1 + $0x130] sm:$0xff] }
   0xd   :  { %185 = vmatpush.msra.mxu1 %v56_v19  ;;  %166 = vmatpush.msra.mxu0 %v39_v21  ;;  %v52_v35 = vld [vmem:[%s856_s1 + $0xb8] sm:$0xff]  ;;  %v35_v37 = vld [vmem:[%s856_s1 + $0x30] sm:$0xff]  ;;  %v66_v40 = vld [vmem:[%s856_s1 + $0x128] sm:$0xff] }
   0xe   :  { %226 = vmatpush.msra.mxu3 %v87_v22  ;;  %207 = vmatpush.msra.mxu2 %v70_v24  ;;  %v83_v38 = vld [vmem:[%s856_s1 + $0x1b0] sm:$0xff]  ;;  %v34_v41 = vld [vmem:[%s856_s1 + $0x28] sm:$0xff]  ;;  %v65_v44 = vld [vmem:[%s856_s1 + $0x120] sm:$0xff] }
   0xf   :  { %186 = vmatpush.msra.mxu1 %v55_v23  ;;  %167 = vmatpush.msra.mxu0 %v38_v25  ;;  %v51_v39 = vld [vmem:[%s856_s1 + $0xb0] sm:$0xff]  ;;  %v82_v42 = vld [vmem:[%s856_s1 + $0x1a8] sm:$0xff]  ;;  %v33_v45 = vld [vmem:[%s856_s1 + $0x20] sm:$0xff] }
  0x10   :  { %227 = vmatpush.msra.mxu3 %v86_v26  ;;  %208 = vmatpush.msra.mxu2 %v69_v28  ;;  %v50_v43 = vld [vmem:[%s856_s1 + $0xa8] sm:$0xff]  ;;  %v81_v46 = vld [vmem:[%s856_s1 + $0x1a0] sm:$0xff]  ;;  %v64_v48 = vld [vmem:[%s856_s1 + $0x118] sm:$0xff] }
  0x11   :  { %187 = vmatpush.msra.mxu1 %v54_v27  ;;  %168 = vmatpush.msra.mxu0 %v37_v29  ;;  %v49_v47 = vld [vmem:[%s856_s1 + $0xa0] sm:$0xff]  ;;  %v32_v49 = vld [vmem:[%s856_s1 + $0x18] sm:$0xff]  ;;  %v63_v52 = vld [vmem:[%s856_s1 + $0x110] sm:$0xff] }
  0x12   :  { %228 = vmatpush.msra.mxu3 %v85_v30  ;;  %209 = vmatpush.msra.mxu2 %v68_v32  ;;  %v80_v50 = vld [vmem:[%s856_s1 + $0x198] sm:$0xff]  ;;  %v31_v53 = vld [vmem:[%s856_s1 + $0x10] sm:$0xff]  ;;  %v62_v56 = vld [vmem:[%s856_s1 + $0x108] sm:$0xff] }
  0x13   :  { %188 = vmatpush.msra.mxu1 %v53_v31  ;;  %169 = vmatpush.msra.mxu0 %v36_v33  ;;  %v48_v51 = vld [vmem:[%s856_s1 + $0x98] sm:$0xff]  ;;  %v79_v54 = vld [vmem:[%s856_s1 + $0x190] sm:$0xff]  ;;  %v30_v57 = vld [vmem:[%s856_s1 + $0x8] sm:$0xff] }
  0x14   :  { %229 = vmatpush.msra.mxu3 %v84_v34  ;;  %210 = vmatpush.msra.mxu2 %v67_v36  ;;  %v47_v55 = vld [vmem:[%s856_s1 + $0x90] sm:$0xff]  ;;  %v78_v58 = vld [vmem:[%s856_s1 + $0x188] sm:$0xff]  ;;  %v61_v60 = vld [vmem:[%s856_s1 + $0x100] sm:$0xff] }
  0x15   :  { %189 = vmatpush.msra.mxu1 %v52_v35  ;;  %170 = vmatpush.msra.mxu0 %v35_v37  ;;  %v46_v59 = vld [vmem:[%s856_s1 + $0x88] sm:$0xff]  ;;  %v29_v61 = vld [vmem:[%s856_s1] sm:$0xff]  ;;  %v140_v62 = vld [vmem:[%s856_s1 + $0x378] sm:$0xff] }
  0x16   :  { %230 = vmatpush.msra.mxu3 %v83_v38  ;;  %211 = vmatpush.msra.mxu2 %v66_v40  ;;  %v77_v63 = vld [vmem:[%s856_s1 + $0x180] sm:$0xff]  ;;  %v108_v0 = vld [vmem:[%s856_s1 + $0x278] sm:$0xff]  ;;  %v139_v2 = vld [vmem:[%s856_s1 + $0x370] sm:$0xff] }
  0x17   :  { %190 = vmatpush.msra.mxu1 %v51_v39  ;;  %171 = vmatpush.msra.mxu0 %v34_v41  ;;  %v156_v1 = vld [vmem:[%s856_s1 + $0x3f8] sm:$0xff]  ;;  %v45_v3 = vld [vmem:[%s856_s1 + $0x80] sm:$0xff]  ;;  %v107_v4 = vld [vmem:[%s856_s1 + $0x270] sm:$0xff] }
  0x18   :  { %231 = vmatpush.msra.mxu3 %v82_v42  ;;  %212 = vmatpush.msra.mxu2 %v65_v44  ;;  %v124_v5 = vld [vmem:[%s856_s1 + $0x2f8] sm:$0xff]  ;;  %v138_v6 = vld [vmem:[%s856_s1 + $0x368] sm:$0xff]  ;;  %v155_v7 = vld [vmem:[%s856_s1 + $0x3f0] sm:$0xff] }
  0x19   :  { %191 = vmatpush.msra.mxu1 %v50_v43  ;;  %172 = vmatpush.msra.mxu0 %v33_v45  ;;  %v106_v8 = vld [vmem:[%s856_s1 + $0x268] sm:$0xff]  ;;  %v123_v9 = vld [vmem:[%s856_s1 + $0x2f0] sm:$0xff]  ;;  %v137_v10 = vld [vmem:[%s856_s1 + $0x360] sm:$0xff] }
  0x1a   :  { %232 = vmatpush.msra.mxu3 %v81_v46  ;;  %213 = vmatpush.msra.mxu2 %v64_v48  ;;  %v154_v11 = vld [vmem:[%s856_s1 + $0x3e8] sm:$0xff]  ;;  %v105_v12 = vld [vmem:[%s856_s1 + $0x260] sm:$0xff]  ;;  %v136_v14 = vld [vmem:[%s856_s1 + $0x358] sm:$0xff] }
  0x1b   :  { %192 = vmatpush.msra.mxu1 %v49_v47  ;;  %173 = vmatpush.msra.mxu0 %v32_v49  ;;  %v122_v13 = vld [vmem:[%s856_s1 + $0x2e8] sm:$0xff]  ;;  %v153_v15 = vld [vmem:[%s856_s1 + $0x3e0] sm:$0xff]  ;;  %v104_v16 = vld [vmem:[%s856_s1 + $0x258] sm:$0xff] }
  0x1c   :  { %233 = vmatpush.msra.mxu3 %v80_v50  ;;  %214 = vmatpush.msra.mxu2 %v63_v52  ;;  %v121_v17 = vld [vmem:[%s856_s1 + $0x2e0] sm:$0xff]  ;;  %v135_v18 = vld [vmem:[%s856_s1 + $0x350] sm:$0xff]  ;;  %v152_v19 = vld [vmem:[%s856_s1 + $0x3d8] sm:$0xff] }
  0x1d   :  { %193 = vmatpush.msra.mxu1 %v48_v51  ;;  %174 = vmatpush.msra.mxu0 %v31_v53  ;;  %v103_v20 = vld [vmem:[%s856_s1 + $0x250] sm:$0xff]  ;;  %v120_v21 = vld [vmem:[%s856_s1 + $0x2d8] sm:$0xff]  ;;  %v134_v22 = vld [vmem:[%s856_s1 + $0x348] sm:$0xff] }
  0x1e   :  { %234 = vmatpush.msra.mxu3 %v79_v54  ;;  %215 = vmatpush.msra.mxu2 %v62_v56  ;;  %v151_v23 = vld [vmem:[%s856_s1 + $0x3d0] sm:$0xff]  ;;  %v102_v24 = vld [vmem:[%s856_s1 + $0x248] sm:$0xff]  ;;  %v133_v26 = vld [vmem:[%s856_s1 + $0x340] sm:$0xff] }
  0x1f   :  { %194 = vmatpush.msra.mxu1 %v47_v55  ;;  %175 = vmatpush.msra.mxu0 %v30_v57  ;;  %v119_v25 = vld [vmem:[%s856_s1 + $0x2d0] sm:$0xff]  ;;  %v150_v27 = vld [vmem:[%s856_s1 + $0x3c8] sm:$0xff]  ;;  %v101_v28 = vld [vmem:[%s856_s1 + $0x240] sm:$0xff] }
  0x20   :  { %235 = vmatpush.msra.mxu3 %v78_v58  ;;  %216 = vmatpush.msra.mxu2 %v61_v60  ;;  %v118_v29 = vld [vmem:[%s856_s1 + $0x2c8] sm:$0xff]  ;;  %v132_v30 = vld [vmem:[%s856_s1 + $0x338] sm:$0xff]  ;;  %v149_v31 = vld [vmem:[%s856_s1 + $0x3c0] sm:$0xff] }
  0x21   :  { %195 = vmatpush.msra.mxu1 %v46_v59  ;;  %176 = vmatpush.msra.mxu0 %v29_v61  ;;  %v100_v32 = vld [vmem:[%s856_s1 + $0x238] sm:$0xff]  ;;  %v117_v33 = vld [vmem:[%s856_s1 + $0x2c0] sm:$0xff] }
  0x22   :  { %281 = vmatpush.msrb.mxu2 %v140_v62  ;;  %236 = vmatpush.msra.mxu3 %v77_v63 }
  0x23   :  { %241 = vmatpush.msrb.mxu0 %v108_v0  ;;  %196 = vmatpush.msra.mxu1 %v45_v3 }
  0x24   :  { %301 = vmatpush.msrb.mxu3 %v156_v1  ;;  %282 = vmatpush.msrb.mxu2 %v139_v2 }
  0x25   :  { %242 = vmatpush.msrb.mxu0 %v107_v4  ;;  %261 = vmatpush.msrb.mxu1 %v124_v5 }
  0x26   :  { %283 = vmatpush.msrb.mxu2 %v138_v6  ;;  %302 = vmatpush.msrb.mxu3 %v155_v7 }
  0x27   :  { %243 = vmatpush.msrb.mxu0 %v106_v8  ;;  %262 = vmatpush.msrb.mxu1 %v123_v9 }
  0x28   :  { %284 = vmatpush.msrb.mxu2 %v137_v10  ;;  %303 = vmatpush.msrb.mxu3 %v154_v11 }
  0x29   :  { %244 = vmatpush.msrb.mxu0 %v105_v12  ;;  %263 = vmatpush.msrb.mxu1 %v122_v13 }
  0x2a   :  { %285 = vmatpush.msrb.mxu2 %v136_v14  ;;  %304 = vmatpush.msrb.mxu3 %v153_v15 }
  0x2b   :  { %245 = vmatpush.msrb.mxu0 %v104_v16  ;;  %264 = vmatpush.msrb.mxu1 %v121_v17 }
  0x2c   :  { %286 = vmatpush.msrb.mxu2 %v135_v18  ;;  %305 = vmatpush.msrb.mxu3 %v152_v19 }
  0x2d   :  { %246 = vmatpush.msrb.mxu0 %v103_v20  ;;  %265 = vmatpush.msrb.mxu1 %v120_v21 }
  0x2e   :  { %287 = vmatpush.msrb.mxu2 %v134_v22  ;;  %306 = vmatpush.msrb.mxu3 %v151_v23 }
  0x2f   :  { %247 = vmatpush.msrb.mxu0 %v102_v24  ;;  %266 = vmatpush.msrb.mxu1 %v119_v25 }
  0x30   :  { %288 = vmatpush.msrb.mxu2 %v133_v26  ;;  %307 = vmatpush.msrb.mxu3 %v150_v27 }
  0x31   :  { %10 = vsyncpa [#allocation3], 0  ;;  %248 = vmatpush.msrb.mxu0 %v101_v28  ;;  %267 = vmatpush.msrb.mxu1 %v118_v29  ;;  %v131_v34 = vld [vmem:[%s856_s1 + $0x330] sm:$0xff]  ;;  %v148_v35 = vld [vmem:[%s856_s1 + $0x3b8] sm:$0xff]  ;;  %vm331_vm0 = vcmask 1043456   ;;  %vm327_vm1 = vcmask 31744  }
  0x32   :  { %289 = vmatpush.msrb.mxu2 %v132_v30  ;;  %308 = vmatpush.msrb.mxu3 %v149_v31  ;;  %v99_v36 = vld [vmem:[%s856_s1 + $0x230] sm:$0xff]  ;;  %v116_v37 = vld [vmem:[%s856_s1 + $0x2b8] sm:$0xff]  ;;  %v130_v38 = vld [vmem:[%s856_s1 + $0x328] sm:$0xff]  ;;  %s364_s21 = sshll.u32 %s860_s5, 4  ;;  %vm355_vm2 = vcmask 64512   ;;  %s365_s21 = int_to_ptr.hbm [resolvable:$true] %s364_s21 }
  0x33   :  { %249 = vmatpush.msrb.mxu0 %v100_v32  ;;  %268 = vmatpush.msrb.mxu1 %v117_v33  ;;  %v147_v39 = vld [vmem:[%s856_s1 + $0x3b0] sm:$0xff]  ;;  %v98_v40 = vld [vmem:[%s856_s1 + $0x228] sm:$0xff]  ;;  %v129_v42 = vld [vmem:[%s856_s1 + $0x320] sm:$0xff] }
  0x34   :  { %290 = vmatpush.msrb.mxu2 %v131_v34  ;;  %309 = vmatpush.msrb.mxu3 %v148_v35  ;;  %v115_v41 = vld [vmem:[%s856_s1 + $0x2b0] sm:$0xff]  ;;  %v146_v43 = vld [vmem:[%s856_s1 + $0x3a8] sm:$0xff]  ;;  %v97_v45 = vld [vmem:[%s856_s1 + $0x220] sm:$0xff] }
  0x35   :  { %250 = vmatpush.msrb.mxu0 %v99_v36  ;;  %269 = vmatpush.msrb.mxu1 %v116_v37  ;;  %v23_v44 = vld [vmem:[%s855_s0 + $0x10] sm:$0xff]  ;;  %v114_v46 = vld [vmem:[%s856_s1 + $0x2a8] sm:$0xff]  ;;  %v128_v47 = vld [vmem:[%s856_s1 + $0x318] sm:$0xff] }
  0x36   :  { %291 = vmatpush.msrb.mxu2 %v130_v38  ;;  %310 = vmatpush.msrb.mxu3 %v147_v39  ;;  %v145_v48 = vld [vmem:[%s856_s1 + $0x3a0] sm:$0xff]  ;;  %v24_v50 = vld [vmem:[%s855_s0 + $0x18] sm:$0xff]  ;;  %v127_v53 = vld [vmem:[%s856_s1 + $0x310] sm:$0xff] }
  0x37   :  { %251 = vmatpush.msrb.mxu0 %v98_v40  ;;  %270 = vmatpush.msrb.mxu1 %v115_v41  ;;  %v21_v49 = vld [vmem:[%s855_s0] sm:$0xff]  ;;  %v96_v51 = vld [vmem:[%s856_s1 + $0x218] sm:$0xff]  ;;  %v22_v55 = vld [vmem:[%s855_s0 + $0x8] sm:$0xff] }
  0x38   :  { %292 = vmatpush.msrb.mxu2 %v129_v42  ;;  %311 = vmatpush.msrb.mxu3 %v146_v43  ;;  %v113_v52 = vld [vmem:[%s856_s1 + $0x2a0] sm:$0xff]  ;;  %v144_v54 = vld [vmem:[%s856_s1 + $0x398] sm:$0xff]  ;;  %v95_v56 = vld [vmem:[%s856_s1 + $0x210] sm:$0xff] }
  0x39   :  { %217 = vmatmul.f32.vlgmr.msra.gmra.mxu2 %v23_v44  ;;  %252 = vmatpush.msrb.mxu0 %v97_v45  ;;  %v112_v57 = vld [vmem:[%s856_s1 + $0x298] sm:$0xff]  ;;  %v126_v58 = vld [vmem:[%s856_s1 + $0x308] sm:$0xff]  ;;  %v143_v59 = vld [vmem:[%s856_s1 + $0x390] sm:$0xff] }
  0x3a   :  { %271 = vmatpush.msrb.mxu1 %v114_v46  ;;  %293 = vmatpush.msrb.mxu2 %v128_v47  ;;  %v94_v60 = vld [vmem:[%s856_s1 + $0x208] sm:$0xff]  ;;  %v111_v61 = vld [vmem:[%s856_s1 + $0x290] sm:$0xff]  ;;  %v125_v62 = vld [vmem:[%s856_s1 + $0x300] sm:$0xff] }
  0x3b   :  { %312 = vmatpush.msrb.mxu3 %v145_v48  ;;  %177 = vmatmul.f32.vlgmr.msra.gmra.mxu0 %v21_v49  ;;  %v142_v63 = vld [vmem:[%s856_s1 + $0x388] sm:$0xff]  ;;  %v27_v0 = vld [vmem:[%s855_s0 + $0x30] sm:$0xff]  ;;  %v93_v1 = vld [vmem:[%s856_s1 + $0x200] sm:$0xff] }
  0x3c   :  { %237 = vmatmul.f32.vlgmr.msra.gmra.mxu3 %v24_v50  ;;  %253 = vmatpush.msrb.mxu0 %v96_v51  ;;  %v110_v2 = vld [vmem:[%s856_s1 + $0x288] sm:$0xff]  ;;  %v141_v3 = vld [vmem:[%s856_s1 + $0x380] sm:$0xff]  ;;  %v28_v5 = vld [vmem:[%s855_s0 + $0x38] sm:$0xff] }
  0x3d   :  { %272 = vmatpush.msrb.mxu1 %v113_v52  ;;  %294 = vmatpush.msrb.mxu2 %v127_v53  ;;  %v25_v4 = vld [vmem:[%s855_s0 + $0x20] sm:$0xff]  ;;  %v26_v7 = vld [vmem:[%s855_s0 + $0x28] sm:$0xff] }
  0x3e   :  { %313 = vmatpush.msrb.mxu3 %v144_v54  ;;  %197 = vmatmul.f32.vlgmr.msra.gmra.mxu1 %v22_v55  ;;  %v109_v6 = vld [vmem:[%s856_s1 + $0x280] sm:$0xff] }
  0x3f   :  { %254 = vmatpush.msrb.mxu0 %v95_v56  ;;  %273 = vmatpush.msrb.mxu1 %v112_v57  ;;  %v322_v8 = vld [vmem:[%s858_s3] sm:$0xf] }
  0x40   :  { %295 = vmatpush.msrb.mxu2 %v126_v58  ;;  %314 = vmatpush.msrb.mxu3 %v143_v59  ;;  %v376_v9 = vld [vmem:[%s857_s2] ss:$0 sm:$0xff]  ;;  %s404_s2 = smov [#allocation2]  }
  0x41   :  { %255 = vmatpush.msrb.mxu0 %v94_v60  ;;  %274 = vmatpush.msrb.mxu1 %v111_v61  ;;  %v377_v27 = vld [vmem:[%s859_s4] ss:$0 sm:$0xff]  ;;  %s362_s3 = sshll.u32 %s404_s2, 4  ;;  %s363_s3 = int_to_ptr.vmem [resolvable:$true] %s362_s3 }
  0x42   :  { %296 = vmatpush.msrb.mxu2 %v125_v62  ;;  %315 = vmatpush.msrb.mxu3 %v142_v63 }
  0x43   :  { %297 = vmatmul.f32.vlgmr.msrb.gmra.mxu2 %v27_v0  ;;  %256 = vmatpush.msrb.mxu0 %v93_v1 }
  0x44   :  { %275 = vmatpush.msrb.mxu1 %v110_v2  ;;  %316 = vmatpush.msrb.mxu3 %v141_v3 }
  0x45   :  { %257 = vmatmul.f32.vlgmr.msrb.gmra.mxu0 %v25_v4  ;;  %317 = vmatmul.f32.vlgmr.msrb.gmra.mxu3 %v28_v5 }
  0x46   :  { %276 = vmatpush.msrb.mxu1 %v109_v6  ;;  %373 = vmatpush.msk.msra.mxu0 %vm331_vm0, %v322_v8 }
  0x47   :  { %277 = vmatmul.f32.vlgmr.msrb.gmra.mxu1 %v26_v7 }
  0xb8   :  { %v178_v10 = vpop.f32.mrf.mxu0 }
  0xb9   :  { %v179_v11 = vadd.f32 %v376_v9, %v178_v10 }
  0xbb   :  { %v198_v12 = vpop.f32.mrf.mxu1 }
  0xbc   :  { %v199_v13 = vadd.f32 %v198_v12, %v179_v11  ;;  %v218_v14 = vpop.f32.mrf.mxu2 }
  0xbe   :  { %v219_v15 = vadd.f32 %v218_v14, %v199_v13 }
  0xbf   :  { %v238_v16 = vpop.f32.mrf.mxu3 }
  0xc0   :  { %v239_v17 = vadd.f32 %v238_v16, %v219_v15 }
  0xc2   :  { %v258_v18 = vpop.f32.mrf.mxu0 }
  0xc3   :  { %v259_v19 = vadd.f32 %v258_v18, %v239_v17 }
  0xc4   :  { %v278_v20 = vpop.f32.mrf.mxu1 }
  0xc5   :  { %v279_v21 = vadd.f32 %v278_v20, %v259_v19 }
  0xc6   :  { %v298_v22 = vpop.f32.mrf.mxu2 }
  0xc7   :  { %v299_v23 = vadd.f32 %v298_v22, %v279_v21 }
  0xc8   :  { %v318_v24 = vpop.f32.mrf.mxu3 }
  0xc9   :  { %v319_v25 = vadd.f32 %v318_v24, %v299_v23 }
  0xcb   :  { %v321_v26 = vmax.f32 %v319_v25, 0.0 }
  0xcd   :  { %374 = vmatmul.msk.f32.vlgmr.msra.gmra.mxu0 %vm327_vm1, %v321_v26 }
 0x14a   :  { %v352_v28 = vpop.f32.mrf.mxu0 }
 0x14b   :  { %v353_v29 = vadd.f32 %v377_v27, %v352_v28 }
 0x14d   :  { %356 = vst.msk [vmem:[#allocation2] sm:$0xff] %vm355_vm2, %v353_v29 }
 0x14e   :  { %367 = dma.vmem_to_hbm [thread:$0]  %s363_s3, 128, %s365_s21, [#allocation3]  }
 0x14f   :  { %402 = dma.done.wait [#allocation3], 128  }
 0x150   :  { %403 = vsyncadd [#allocation3], 4294967168 }
 0x151   :  { %372 = vsyncpa [#allocation3], 1 }

</bundles_post_ra>
